<compile_context>
chip_gen: v5e
topology: v5e:2x2
jax: 0.10.0
libtpu: 0.0.40
codegen_flags: <defaults>
</compile_context>

<pallas_src>
import math

import jax
import jax.numpy as jnp
from jax.experimental import pallas as pl
from jax.experimental.pallas import tpu as pltpu

# ---------------- model dims (small, consistent with the forward) -----------
E = 32                       # embedding dim
H = 32                       # hidden dim of sampler / value MLPs
D = 4                        # number of spectral-line model parameters
LOG2PI = math.log(2.0 * math.pi)
LOG_STD_CLAMP = 8.0          # keep exp(+-log_std) finite


# ---------------- small pallas_call helper (single-step, full-array tiles) --
def _full_spec(shape):
    nd = len(shape)
    return pl.BlockSpec(shape, lambda *_: (0,) * nd)


def _call(kernel, out_shapes, inputs):
    """Single grid step; every array is one full-array VMEM block.

    `out_shapes` is always a list of shape tuples (all float32 outputs).
    """
    out_shape = tuple(jax.ShapeDtypeStruct(s, jnp.float32) for s in out_shapes)
    out_specs = tuple(_full_spec(s) for s in out_shapes)
    outs = pl.pallas_call(
        kernel,
        out_shape=out_shape,
        grid=(1,),
        in_specs=[_full_spec(tuple(x.shape)) for x in inputs],
        out_specs=out_specs,
        compiler_params=pltpu.CompilerParams(dimension_semantics=("arbitrary",)),
    )(*inputs)
    return outs[0] if len(out_shapes) == 1 else outs


# =====================  backbone: batched cross-attention  ==================
def _make_backbone_kernel(n_iter):
    scale = 1.0 / math.sqrt(E)

    def kernel(obs_ref, sl_ref, bias_ref, wq_ref, wkv_ref, wo_ref, out_ref):
        obs = obs_ref[...]                      # (B, S_obs, E)
        bias = bias_ref[...]                    # (B, 1, S_obs)
        wq = wq_ref[...]
        wo = wo_ref[...]

        # K and V depend only on embed_obs: compute once, fused (E, 2E) matmul.
        kv = jnp.einsum("bse,ef->bsf", obs, wkv_ref[...],
                        preferred_element_type=jnp.float32)   # (B, S_obs, 2E)
        k = kv[:, :, :E]
        v = kv[:, :, E:]

        sl = sl_ref[...]                        # (B, S_sl, E)
        # `recycling` fused: static unroll (n_iter is compile-time known/small),
        # the (B, S_sl, E) intermediate never leaves VMEM.
        for _ in range(n_iter):
            q = jnp.einsum("bqe,ef->bqf", sl, wq,
                           preferred_element_type=jnp.float32)
            s = jnp.einsum("bqe,bke->bqk", q, k,
                           preferred_element_type=jnp.float32) * scale + bias
            s = s - jnp.max(s, axis=-1, keepdims=True)
            p = jnp.exp(s)
            p = p * pl.reciprocal(jnp.sum(p, axis=-1, keepdims=True), approx=True)
            ctx = jnp.einsum("bqk,bke->bqe", p, v,
                             preferred_element_type=jnp.float32)
            sl = sl + jnp.einsum("bqe,ef->bqf", ctx, wo,
                                 preferred_element_type=jnp.float32)
        out_ref[...] = sl

    return kernel


def backbone_forward(embed_obs, embed_sl, key_padding_mask, recycling, params):
    B, S_obs, _ = embed_obs.shape
    S_sl = embed_sl.shape[1]
    if key_padding_mask is None:
        bias = jnp.zeros((B, 1, S_obs), jnp.float32)
    else:
        bias = jnp.where(key_padding_mask, -1e9, 0.0
                         ).astype(jnp.float32).reshape(B, 1, S_obs)
    # TODO(synk): real backbone internals unspecified; `recycling` implemented
    # as extra refinement passes of the attention block.
    n_iter = 1 if recycling is None else int(recycling) + 1
    return _call(
        _make_backbone_kernel(n_iter),
        [(B, S_sl, E)],
        [embed_obs, embed_sl, bias, params["wq"], params["wkv"], params["wo"]],
    )


# =====================  sampler / value heads (shared helpers)  =============
def _gaussian_head(e0, w1, b1, wmu, bmu, wls, bls):
    h = jnp.maximum(jnp.dot(e0, w1, preferred_element_type=jnp.float32) + b1, 0.0)
    mu = jnp.dot(h, wmu, preferred_element_type=jnp.float32) + bmu
    log_std = jnp.dot(h, wls, preferred_element_type=jnp.float32) + bls
    log_std = jnp.clip(log_std, -LOG_STD_CLAMP, LOG_STD_CLAMP)
    return mu, log_std                                  # both (B, D)


def _value_head(e0, w1, b1, w2r, b2):
    h = jnp.maximum(jnp.dot(e0, w1, preferred_element_type=jnp.float32) + b1, 0.0)
    # w2r stored as (1, H): contract H against (B, H) -> lane-dense (1, B),
    # no in-kernel transpose required.
    return jnp.einsum("kh,bh->kb", w2r, h, preferred_element_type=jnp.float32) + b2


# ----- mode 3: sample + log_prob ---------------------------------------------
def _sample_kernel(e0_ref, eps_ref, w1, b1, wmu, bmu, wls, bls,
                   samps_ref, lp_ref):
    mu, log_std = _gaussian_head(e0_ref[...], w1[...], b1[...],
                                 wmu[...], bmu[...], wls[...], bls[...])
    eps = eps_ref[...]                                   # (B, n_draw, D)
    samps_ref[...] = mu[:, None, :] + jnp.exp(log_std)[:, None, :] * eps
    lp_ref[...] = -0.5 * jnp.sum(eps * eps + 2.0 * log_std[:, None, :] + LOG2PI,
                                 axis=-1)                # (B, n_draw)


def sampler_sample(e0, eps, params):
    B, n_draw, _ = eps.shape
    return _call(
        _sample_kernel, [(B, n_draw, D), (B, n_draw)],
        [e0, eps, params["s_w1"], params["s_b1"], params["s_wmu"],
         params["s_bmu"], params["s_wls"], params["s_bls"]])


# ----- mode 4: log_prob at given points --------------------------------------
def _logprob_kernel(e0_ref, param_ref, w1, b1, wmu, bmu, wls, bls, lp_ref):
    mu, log_std = _gaussian_head(e0_ref[...], w1[...], b1[...],
                                 wmu[...], bmu[...], wls[...], bls[...])
    z = (param_ref[...] - mu[:, None, :]) * jnp.exp(-log_std)[:, None, :]
    lp_ref[...] = -0.5 * jnp.sum(z * z + 2.0 * log_std[:, None, :] + LOG2PI,
                                 axis=-1)                # (B, N)


def sampler_log_prob(e0, param, params):
    B, N, _ = param.shape
    return _call(
        _logprob_kernel, [(B, N)],
        [e0, param, params["s_w1"], params["s_b1"], params["s_wmu"],
         params["s_bmu"], params["s_wls"], params["s_bls"]])


# ----- mode 2: value function -------------------------------------------------
def _value_kernel(e0_ref, vw1, vb1, vw2r, vb2, val_ref):
    val_ref[...] = _value_head(e0_ref[...], vw1[...], vb1[...],
                               vw2r[...], vb2[...])      # (1, B) lane-dense


def value_forward(e0, params):
    B = e0.shape[0]
    return _call(
        _value_kernel, [(1, B)],
        [e0, params["v_w1"], params["v_b1"], params["v_w2r"], params["v_b2"]])


# ----- fused sampler + value (hot path used by draw_samples) ------------------
def _sample_value_kernel(e0_ref, eps_ref,
                         w1, b1, wmu, bmu, wls, bls,
                         vw1, vb1, vw2r, vb2,
                         samps_ref, lp_ref, val_ref):
    e0 = e0_ref[...]                                     # (B, E)
    mu, log_std = _gaussian_head(e0, w1[...], b1[...],
                                 wmu[...], bmu[...], wls[...], bls[...])
    eps = eps_ref[...]                                   # (B, n_draw, D)
    samps_ref[...] = mu[:, None, :] + jnp.exp(log_std)[:, None, :] * eps
    lp_ref[...] = -0.5 * jnp.sum(eps * eps + 2.0 * log_std[:, None, :] + LOG2PI,
                                 axis=-1)                # (B, n_draw)
    val_ref[...] = _value_head(e0, vw1[...], vb1[...], vw2r[...], vb2[...])


def sample_and_value(e0, eps, params):
    B, n_draw, _ = eps.shape
    return _call(
        _sample_value_kernel, [(B, n_draw, D), (B, n_draw), (1, B)],
        [e0, eps,
         params["s_w1"], params["s_b1"], params["s_wmu"], params["s_bmu"],
         params["s_wls"], params["s_bls"],
         params["v_w1"], params["v_b1"], params["v_w2r"], params["v_b2"]])


# =====================  parameter initialization  ===========================
def init_params(key):
    ks = jax.random.split(key, 9)

    def lin(k, fan_in, fan_out):
        return (jax.random.normal(k, (fan_in, fan_out), jnp.float32)
                / math.sqrt(fan_in))

    return {
        "wq": lin(ks[0], E, E),
        # fused [K | V] projection for better MXU N-dim utilization
        "wkv": jnp.concatenate([lin(ks[1], E, E), lin(ks[2], E, E)], axis=1),
        "wo": lin(ks[3], E, E),
        "s_w1": lin(ks[4], E, H), "s_b1": jnp.zeros((1, H), jnp.float32),
        "s_wmu": lin(ks[5], H, D), "s_bmu": jnp.zeros((1, D), jnp.float32),
        "s_wls": lin(ks[6], H, D), "s_bls": jnp.zeros((1, D), jnp.float32),
        "v_w1": lin(ks[7], E, H), "v_b1": jnp.zeros((1, H), jnp.float32),
        "v_w2r": lin(ks[8], H, 1).T,          # stored as (1, H) row form
        "v_b2": jnp.zeros((1, 1), jnp.float32),
    }


# =====================  ParameterEstimator (forward dispatch)  ==============
class ParameterEstimator:
    def __init__(self, params):
        self.params = params

    def __call__(self, *, param=None, n_draw=None, embed_obs=None, embed_sl=None,
                 key_padding_mask=None, embed=None, vf_mode=False, recycling=None,
                 rng=None):
        # Mode 1: run the backbone to obtain embeddings (batch + recycling
        # fused into a single pallas_call).
        if embed_obs is not None and embed_sl is not None:
            return backbone_forward(embed_obs, embed_sl, key_padding_mask,
                                    recycling, self.params)

        # Mode 2: value function.
        if vf_mode:
            return value_forward(embed[:, 0], self.params).reshape(-1, 1)  # (B,1)

        # Mode 3: draw samples + log_prob.  Embedding replication over n_draw
        # happens in-VMEM (broadcast), not via jnp.repeat in the wrapper.
        if n_draw is not None and embed is not None:
            batch_size = embed.shape[0]
            eps = jax.random.normal(rng, (batch_size, n_draw, D), jnp.float32)
            samps, log_prob = sampler_sample(embed[:, 0], eps, self.params)
            return samps, log_prob                      # (B,n_draw,D), (B,n_draw)

        # Mode 4: log_prob at given points (no repeat / flatten needed).
        if param is not None and embed is not None:
            return sampler_log_prob(embed[:, 0], param, self.params)   # (B, N)

        raise NotImplementedError

    def draw_samples(self, n_draw, embed_obs, embed_sl, key_padding_mask=None,
                     recycling=0, rng=None):
        embed = self(embed_obs=embed_obs, embed_sl=embed_sl,
                     key_padding_mask=key_padding_mask, recycling=recycling)
        batch_size = embed.shape[0]
        eps = jax.random.normal(rng, (batch_size, n_draw, D), jnp.float32)
        # Sampler + value_func fused into one pallas_call.  The value head
        # depends only on `embed` (as in the dispatcher), so the detached
        # samples are irrelevant to it here.
        # TODO(synk): sub-module internals are synthetic; numerical parity with
        # the (undefined) PyTorch backbone/sampler/value_func is not asserted.
        samps, log_prob, values = sample_and_value(embed[:, 0], eps, self.params)
        return samps, log_prob, values.reshape(batch_size)


# =============================  demo  =======================================
if __name__ == "__main__":
    B, S_obs, S_sl, n_draw, n_pts = 2, 16, 8, 8, 5

    key = jax.random.PRNGKey(0)
    k_obs, k_sl, k_param, k_eps = jax.random.split(key, 4)
    embed_obs = jax.random.normal(k_obs, (B, S_obs, E), jnp.float32)
    embed_sl = jax.random.normal(k_sl, (B, S_sl, E), jnp.float32)
    key_padding_mask = jnp.zeros((B, S_obs), dtype=bool).at[1, 12:].set(True)

    est = ParameterEstimator(init_params(jax.random.PRNGKey(42)))

    # hot path: backbone (recycling fused) -> fused sampler+value
    samps, log_prob, values = est.draw_samples(
        n_draw, embed_obs, embed_sl, key_padding_mask=key_padding_mask,
        recycling=1, rng=k_eps)

    # explicit individual modes
    embed = est(embed_obs=embed_obs, embed_sl=embed_sl,
                key_padding_mask=key_padding_mask)
    param = jax.random.normal(k_param, (B, n_pts, D), jnp.float32)
    lp_at = est(param=param, embed=embed)                    # mode 4
    vals2 = est(embed=embed, vf_mode=True)                   # mode 2
    samps2, lp2 = est(n_draw=n_draw, embed=embed, rng=k_eps)  # mode 3

    jax.block_until_ready((samps, log_prob, values, lp_at, vals2, samps2, lp2))

    assert samps.shape == (B, n_draw, D)
    assert log_prob.shape == (B, n_draw)
    assert values.shape == (B,)
    assert lp_at.shape == (B, n_pts)
    assert vals2.shape == (B, 1)
    assert samps2.shape == (B, n_draw, D) and lp2.shape == (B, n_draw)
    assert all(bool(jnp.all(jnp.isfinite(x)))
               for x in (samps, log_prob, values, lp_at, vals2, samps2, lp2))
    print("KERNEL_OK")
</pallas_src>

<mosaic_0001>
module attributes {stable_mosaic.version = 11 : i64} {
  func.func @kernel(%arg0: i32, %arg1: memref<2x16x32xf32, #tpu.memory_space<vmem>>, %arg2: memref<2x8x32xf32, #tpu.memory_space<vmem>>, %arg3: memref<2x1x16xf32, #tpu.memory_space<vmem>>, %arg4: memref<32x32xf32, #tpu.memory_space<vmem>>, %arg5: memref<32x64xf32, #tpu.memory_space<vmem>>, %arg6: memref<32x32xf32, #tpu.memory_space<vmem>>, %arg7: memref<2x8x32xf32, #tpu.memory_space<vmem>>) attributes {dimension_semantics = [#tpu.dimension_semantics<arbitrary>], iteration_bounds = array<i64: 1>, scalar_prefetch = 0 : i64, scratch_operands = 0 : i64, tpu.core_type = #tpu.core_type<tc>, window_params = [{pipeline_mode = #tpu.pipeline_mode<synchronous>, transform_indices = @transform_0, window_bounds = array<i64: 2, 16, 32>}, {pipeline_mode = #tpu.pipeline_mode<synchronous>, transform_indices = @transform_1, window_bounds = array<i64: 2, 8, 32>}, {pipeline_mode = #tpu.pipeline_mode<synchronous>, transform_indices = @transform_2, window_bounds = array<i64: 2, 1, 16>}, {pipeline_mode = #tpu.pipeline_mode<synchronous>, transform_indices = @transform_3, window_bounds = array<i64: 32, 32>}, {pipeline_mode = #tpu.pipeline_mode<synchronous>, transform_indices = @transform_4, window_bounds = array<i64: 32, 64>}, {pipeline_mode = #tpu.pipeline_mode<synchronous>, transform_indices = @transform_5, window_bounds = array<i64: 32, 32>}, {pipeline_mode = #tpu.pipeline_mode<synchronous>, transform_indices = @transform_6, window_bounds = array<i64: 2, 8, 32>}]} {
    %c0 = arith.constant 0 : index
    %c0_0 = arith.constant 0 : index
    %c0_1 = arith.constant 0 : index
    %0 = vector.load %arg1[%c0, %c0_0, %c0_1] : memref<2x16x32xf32, #tpu.memory_space<vmem>>, vector<2x16x32xf32>
    %c0_2 = arith.constant 0 : index
    %c0_3 = arith.constant 0 : index
    %c0_4 = arith.constant 0 : index
    %1 = vector.load %arg3[%c0_2, %c0_3, %c0_4] : memref<2x1x16xf32, #tpu.memory_space<vmem>>, vector<2x1x16xf32>
    %c0_5 = arith.constant 0 : index
    %c0_6 = arith.constant 0 : index
    %2 = vector.load %arg4[%c0_5, %c0_6] : memref<32x32xf32, #tpu.memory_space<vmem>>, vector<32x32xf32>
    %c0_7 = arith.constant 0 : index
    %c0_8 = arith.constant 0 : index
    %3 = vector.load %arg6[%c0_7, %c0_8] : memref<32x32xf32, #tpu.memory_space<vmem>>, vector<32x32xf32>
    %c0_9 = arith.constant 0 : index
    %c0_10 = arith.constant 0 : index
    %4 = vector.load %arg5[%c0_9, %c0_10] : memref<32x64xf32, #tpu.memory_space<vmem>>, vector<32x64xf32>
    "tpu.trace_start"() <{level = 10 : i32, message = "bse,ef->bsf"}> : () -> ()
    %cst = arith.constant dense<0.000000e+00> : vector<2x16x64xf32>
    %5 = tpu.matmul %0, %4, %cst {dimension_numbers = #tpu.dot_dimension_numbers<[2], [0], [0, 1], [1], [0, 0, 0, 1, 1, 1], [], []>} : vector<2x16x32xf32>, vector<32x64xf32>, vector<2x16x64xf32> -> vector<2x16x64xf32>
    "tpu.trace_stop"() : () -> ()
    %6 = vector.extract_strided_slice %5 {offsets = [0, 0, 0], sizes = [2, 16, 32], strides = [1, 1, 1]} : vector<2x16x64xf32> to vector<2x16x32xf32>
    %7 = vector.extract_strided_slice %5 {offsets = [0, 0, 32], sizes = [2, 16, 32], strides = [1, 1, 1]} : vector<2x16x64xf32> to vector<2x16x32xf32>
    %c0_11 = arith.constant 0 : index
    %c0_12 = arith.constant 0 : index
    %c0_13 = arith.constant 0 : index
    %8 = vector.load %arg2[%c0_11, %c0_12, %c0_13] : memref<2x8x32xf32, #tpu.memory_space<vmem>>, vector<2x8x32xf32>
    "tpu.trace_start"() <{level = 10 : i32, message = "bqe,ef->bqf"}> : () -> ()
    %cst_14 = arith.constant dense<0.000000e+00> : vector<2x8x32xf32>
    %9 = tpu.matmul %8, %2, %cst_14 {dimension_numbers = #tpu.dot_dimension_numbers<[2], [0], [0, 1], [1], [0, 0, 0, 1, 1, 1], [], []>} : vector<2x8x32xf32>, vector<32x32xf32>, vector<2x8x32xf32> -> vector<2x8x32xf32>
    "tpu.trace_stop"() : () -> ()
    "tpu.trace_start"() <{level = 10 : i32, message = "bqe,bke->bqk"}> : () -> ()
    %cst_15 = arith.constant dense<0.000000e+00> : vector<2x8x16xf32>
    %10 = tpu.matmul %9, %6, %cst_15 {dimension_numbers = #tpu.dot_dimension_numbers<[2], [2], [1], [1], [0, 0, 0, 1, 1, 1], [0], [0]>} : vector<2x8x32xf32>, vector<2x16x32xf32>, vector<2x8x16xf32> -> vector<2x8x16xf32>
    "tpu.trace_stop"() : () -> ()
    %cst_16 = arith.constant 0.176776692 : f32
    %11 = vector.broadcast %cst_16 : f32 to vector<2x8x16xf32>
    %12 = arith.mulf %10, %11 : vector<2x8x16xf32>
    %13 = vector.broadcast %1 : vector<2x1x16xf32> to vector<2x8x16xf32>
    %14 = arith.addf %12, %13 : vector<2x8x16xf32>
    %cst_17 = arith.constant dense<0xFF800000> : vector<2x8xf32>
    %15 = vector.multi_reduction <maximumf>, %14, %cst_17 [2] : vector<2x8x16xf32> to vector<2x8xf32>
    %16 = vector.shape_cast %15 : vector<2x8xf32> to vector<2x8x1xf32>
    %17 = vector.broadcast %16 : vector<2x8x1xf32> to vector<2x8x16xf32>
    %18 = arith.subf %14, %17 : vector<2x8x16xf32>
    %19 = math.exp %18 : vector<2x8x16xf32>
    %cst_18 = arith.constant dense<0.000000e+00> : vector<2x8xf32>
    %20 = vector.multi_reduction <add>, %19, %cst_18 [2] : vector<2x8x16xf32> to vector<2x8xf32>
    %21 = vector.shape_cast %20 : vector<2x8xf32> to vector<2x8x1xf32>
    %22 = tpu.reciprocal %21 {approx = true} : vector<2x8x1xf32> -> vector<2x8x1xf32>
    %23 = vector.broadcast %22 : vector<2x8x1xf32> to vector<2x8x16xf32>
    %24 = arith.mulf %19, %23 : vector<2x8x16xf32>
    "tpu.trace_start"() <{level = 10 : i32, message = "bqk,bke->bqe"}> : () -> ()
    %cst_19 = arith.constant dense<0.000000e+00> : vector<2x8x32xf32>
    %25 = tpu.matmul %24, %7, %cst_19 {dimension_numbers = #tpu.dot_dimension_numbers<[2], [1], [1], [2], [0, 0, 0, 1, 1, 2], [0], [0]>} : vector<2x8x16xf32>, vector<2x16x32xf32>, vector<2x8x32xf32> -> vector<2x8x32xf32>
    "tpu.trace_stop"() : () -> ()
    "tpu.trace_start"() <{level = 10 : i32, message = "bqe,ef->bqf"}> : () -> ()
    %cst_20 = arith.constant dense<0.000000e+00> : vector<2x8x32xf32>
    %26 = tpu.matmul %25, %3, %cst_20 {dimension_numbers = #tpu.dot_dimension_numbers<[2], [0], [0, 1], [1], [0, 0, 0, 1, 1, 1], [], []>} : vector<2x8x32xf32>, vector<32x32xf32>, vector<2x8x32xf32> -> vector<2x8x32xf32>
    "tpu.trace_stop"() : () -> ()
    %27 = arith.addf %8, %26 : vector<2x8x32xf32>
    "tpu.trace_start"() <{level = 10 : i32, message = "bqe,ef->bqf"}> : () -> ()
    %cst_21 = arith.constant dense<0.000000e+00> : vector<2x8x32xf32>
    %28 = tpu.matmul %27, %2, %cst_21 {dimension_numbers = #tpu.dot_dimension_numbers<[2], [0], [0, 1], [1], [0, 0, 0, 1, 1, 1], [], []>} : vector<2x8x32xf32>, vector<32x32xf32>, vector<2x8x32xf32> -> vector<2x8x32xf32>
    "tpu.trace_stop"() : () -> ()
    "tpu.trace_start"() <{level = 10 : i32, message = "bqe,bke->bqk"}> : () -> ()
    %cst_22 = arith.constant dense<0.000000e+00> : vector<2x8x16xf32>
    %29 = tpu.matmul %28, %6, %cst_22 {dimension_numbers = #tpu.dot_dimension_numbers<[2], [2], [1], [1], [0, 0, 0, 1, 1, 1], [0], [0]>} : vector<2x8x32xf32>, vector<2x16x32xf32>, vector<2x8x16xf32> -> vector<2x8x16xf32>
    "tpu.trace_stop"() : () -> ()
    %cst_23 = arith.constant 0.176776692 : f32
    %30 = vector.broadcast %cst_23 : f32 to vector<2x8x16xf32>
    %31 = arith.mulf %29, %30 : vector<2x8x16xf32>
    %32 = vector.broadcast %1 : vector<2x1x16xf32> to vector<2x8x16xf32>
    %33 = arith.addf %31, %32 : vector<2x8x16xf32>
    %cst_24 = arith.constant dense<0xFF800000> : vector<2x8xf32>
    %34 = vector.multi_reduction <maximumf>, %33, %cst_24 [2] : vector<2x8x16xf32> to vector<2x8xf32>
    %35 = vector.shape_cast %34 : vector<2x8xf32> to vector<2x8x1xf32>
    %36 = vector.broadcast %35 : vector<2x8x1xf32> to vector<2x8x16xf32>
    %37 = arith.subf %33, %36 : vector<2x8x16xf32>
    %38 = math.exp %37 : vector<2x8x16xf32>
    %cst_25 = arith.constant dense<0.000000e+00> : vector<2x8xf32>
    %39 = vector.multi_reduction <add>, %38, %cst_25 [2] : vector<2x8x16xf32> to vector<2x8xf32>
    %40 = vector.shape_cast %39 : vector<2x8xf32> to vector<2x8x1xf32>
    %41 = tpu.reciprocal %40 {approx = true} : vector<2x8x1xf32> -> vector<2x8x1xf32>
    %42 = vector.broadcast %41 : vector<2x8x1xf32> to vector<2x8x16xf32>
    %43 = arith.mulf %38, %42 : vector<2x8x16xf32>
    "tpu.trace_start"() <{level = 10 : i32, message = "bqk,bke->bqe"}> : () -> ()
    %cst_26 = arith.constant dense<0.000000e+00> : vector<2x8x32xf32>
    %44 = tpu.matmul %43, %7, %cst_26 {dimension_numbers = #tpu.dot_dimension_numbers<[2], [1], [1], [2], [0, 0, 0, 1, 1, 2], [0], [0]>} : vector<2x8x16xf32>, vector<2x16x32xf32>, vector<2x8x32xf32> -> vector<2x8x32xf32>
    "tpu.trace_stop"() : () -> ()
    "tpu.trace_start"() <{level = 10 : i32, message = "bqe,ef->bqf"}> : () -> ()
    %cst_27 = arith.constant dense<0.000000e+00> : vector<2x8x32xf32>
    %45 = tpu.matmul %44, %3, %cst_27 {dimension_numbers = #tpu.dot_dimension_numbers<[2], [0], [0, 1], [1], [0, 0, 0, 1, 1, 1], [], []>} : vector<2x8x32xf32>, vector<32x32xf32>, vector<2x8x32xf32> -> vector<2x8x32xf32>
    "tpu.trace_stop"() : () -> ()
    %46 = arith.addf %27, %45 : vector<2x8x32xf32>
    %c0_28 = arith.constant 0 : index
    %c0_29 = arith.constant 0 : index
    %c0_30 = arith.constant 0 : index
    %47 = vector.load %arg7[%c0_28, %c0_29, %c0_30] : memref<2x8x32xf32, #tpu.memory_space<vmem>>, vector<2x8x32xf32>
    tpu.vector_store %arg7[%c0_28, %c0_29, %c0_30], %46 {strides = array<i32>} : memref<2x8x32xf32, #tpu.memory_space<vmem>>, vector<2x8x32xf32>,
    return
  }
  func.func @transform_0(%arg0: i32) -> (i32, i32, i32) {
    %c0_i32 = arith.constant 0 : i32
    %c0_i32_0 = arith.constant 0 : i32
    %c0_i32_1 = arith.constant 0 : i32
    %c0_i32_2 = arith.constant 0 : i32
    return %c0_i32, %c0_i32_0, %c0_i32_1 : i32, i32, i32
  }
  func.func @transform_1(%arg0: i32) -> (i32, i32, i32) {
    %c0_i32 = arith.constant 0 : i32
    %c0_i32_0 = arith.constant 0 : i32
    %c0_i32_1 = arith.constant 0 : i32
    %c0_i32_2 = arith.constant 0 : i32
    return %c0_i32, %c0_i32_0, %c0_i32_1 : i32, i32, i32
  }
  func.func @transform_2(%arg0: i32) -> (i32, i32, i32) {
    %c0_i32 = arith.constant 0 : i32
    %c0_i32_0 = arith.constant 0 : i32
    %c0_i32_1 = arith.constant 0 : i32
    %c0_i32_2 = arith.constant 0 : i32
    return %c0_i32, %c0_i32_0, %c0_i32_1 : i32, i32, i32
  }
  func.func @transform_3(%arg0: i32) -> (i32, i32) {
    %c0_i32 = arith.constant 0 : i32
    %c0_i32_0 = arith.constant 0 : i32
    %c0_i32_1 = arith.constant 0 : i32
    return %c0_i32, %c0_i32_0 : i32, i32
  }
  func.func @transform_4(%arg0: i32) -> (i32, i32) {
    %c0_i32 = arith.constant 0 : i32
    %c0_i32_0 = arith.constant 0 : i32
    %c0_i32_1 = arith.constant 0 : i32
    return %c0_i32, %c0_i32_0 : i32, i32
  }
  func.func @transform_5(%arg0: i32) -> (i32, i32) {
    %c0_i32 = arith.constant 0 : i32
    %c0_i32_0 = arith.constant 0 : i32
    %c0_i32_1 = arith.constant 0 : i32
    return %c0_i32, %c0_i32_0 : i32, i32
  }
  func.func @transform_6(%arg0: i32) -> (i32, i32, i32) {
    %c0_i32 = arith.constant 0 : i32
    %c0_i32_0 = arith.constant 0 : i32
    %c0_i32_1 = arith.constant 0 : i32
    %c0_i32_2 = arith.constant 0 : i32
    return %c0_i32, %c0_i32_0, %c0_i32_1 : i32, i32, i32
  }
}

</mosaic_0001>

<bundles_post_ra>
// kernel: tpu_custom_call.1
= control target key start
LH: loop header
LB: loop body
LE: loop exit
PB: predicated region body
PF: predicated region fallthrough
CT: control target
= control target key end

     0   :  { %11 = vsyncpa [#allocation3], 0  ;;  %s1013_s0 = inlined_call_operand.hbm [shape: f32[2,16,32], index: 0, kind: input, shape index: {}]   ;;  %s1014_s1 = inlined_call_operand.hbm [shape: f32[2,8,32], index: 1, kind: input, shape index: {}]   ;;  %s1015_s2 = inlined_call_operand.hbm [shape: f32[2,1,16], index: 2, kind: input, shape index: {}]   ;;  %s1016_s3 = inlined_call_operand.hbm [shape: f32[32,32], index: 3, kind: input, shape index: {}]   ;;  %s1017_s4 = inlined_call_operand.hbm [shape: f32[32,64], index: 4, kind: input, shape index: {}]   ;;  %s1018_s5 = inlined_call_operand.hbm [shape: f32[32,32], index: 5, kind: input, shape index: {}]   ;;  %s1019_s6 = inlined_call_operand.hbm [shape: f32[2,8,32], index: 6, kind: output, shape index: {}]  }
   0x1   :  { %12 = vsyncpa [#allocation6], 0 }
   0x2   :  { %13 = vsyncpa [#allocation9], 0 }
   0x3   :  { %14 = vsyncpa [#allocation12], 0 }
   0x4   :  { %15 = vsyncpa [#allocation4], 0  ;;  %s33_s23 = sshll.u32 %s1014_s1, 4  ;;  %s837_s24 = smov [#allocation5]   ;;  %s34_s23 = int_to_ptr.hbm [resolvable:$true] %s33_s23 }
   0x5   :  { %s35_s25 = sshll.u32 %s837_s24, 4  ;;  %s59_s28 = sshll.u32 %s1016_s3, 4  ;;  %s36_s25 = int_to_ptr.vmem [resolvable:$true] %s35_s25  ;;  %s60_s28 = int_to_ptr.hbm [resolvable:$true] %s59_s28 }
   0x6   :  { %s838_s29 = smov 128   ;;  %s839_s30 = smov 8  }
   0x7   :  { %41 = dma.hbm_to_vmem [thread:$0]  %s34_s23, 256, %s36_s25, [#allocation6], %s838_s29, %s838_s29, %s839_s30  }
   0x8   :  { %s840_s7 = smov [#allocation8]   ;;  %s20_s1 = sshll.u32 %s1013_s0, 4  ;;  %s21_s1 = int_to_ptr.hbm [resolvable:$true] %s20_s1 }
   0x9   :  { %s61_s8 = sshll.u32 %s840_s7, 4  ;;  %s46_s12 = sshll.u32 %s1015_s2, 4  ;;  %s62_s8 = int_to_ptr.vmem [resolvable:$true] %s61_s8  ;;  %s47_s12 = int_to_ptr.hbm [resolvable:$true] %s46_s12 }
   0xa   :  { %67 = dma.hbm_to_vmem [thread:$0]  %s60_s28, 512, %s62_s8, [#allocation9], %s838_s29, %s838_s29, %s839_s30  }
   0xb   :  { %s841_s13 = smov [#allocation2]   ;;  %s842_s15 = smov [#allocation7]  }
   0xc   :  { %s22_s14 = sshll.u32 %s841_s13, 4  ;;  %s48_s0 = sshll.u32 %s842_s15, 4  ;;  %s23_s14 = int_to_ptr.vmem [resolvable:$true] %s22_s14  ;;  %s49_s0 = int_to_ptr.vmem [resolvable:$true] %s48_s0 }
   0xd   :  { %28 = dma.hbm_to_vmem [thread:$0]  %s21_s1, 512, %s23_s14, [#allocation3], %s838_s29, %s838_s29, %s839_s30  }
   0xe   :  { %s843_s16 = smov 16   ;;  %s844_s17 = smov 1  }
   0xf   :  { %54 = dma.hbm_to_vmem [thread:$0]  %s47_s12, 32, %s49_s0, [#allocation6], %s843_s16, %s843_s16, %s844_s17  }
  0x10   :  { %s72_s20 = sshll.u32 %s1017_s4, 4  ;;  %s845_s2 = smov [#allocation10]   ;;  %s73_s20 = int_to_ptr.hbm [resolvable:$true] %s72_s20 }
  0x11   :  { %s74_s21 = sshll.u32 %s845_s2, 4  ;;  %s85_s24 = sshll.u32 %s1018_s5, 4  ;;  %s75_s21 = int_to_ptr.vmem [resolvable:$true] %s74_s21  ;;  %s86_s24 = int_to_ptr.hbm [resolvable:$true] %s85_s24 }
  0x12   :  { %80 = dma.hbm_to_vmem [thread:$0]  %s73_s20, 512, %s75_s21, [#allocation9], %s838_s29, %s838_s29, %s839_s30  }
  0x13   :  { %s846_s25 = smov [#allocation11]  }
  0x14   :  { %s87_s26 = sshll.u32 %s846_s25, 4  ;;  %s88_s26 = int_to_ptr.vmem [resolvable:$true] %s87_s26 }
  0x15   :  { %93 = dma.hbm_to_vmem [thread:$0]  %s86_s24, 512, %s88_s26, [#allocation12], %s838_s29, %s838_s29, %s839_s30  }
  0x16   :  { %827 = dma.done.wait [#allocation3], 512  }
  0x17   :  { %828 = vsyncadd [#allocation3], 4294966784 }
  0x18   :  { %829 = dma.done.wait [#allocation6], 288  }
  0x19   :  { %830 = vsyncadd [#allocation6], 4294967008 }
  0x1a   :  { %831 = dma.done.wait [#allocation9], 1024  }
  0x1b   :  { %832 = vsyncadd [#allocation9], 4294966272 }
  0x1c   :  { %833 = dma.done.wait [#allocation12], 512  }
  0x1d   :  { %834 = vsyncadd [#allocation12], 4294966784  ;;  %v135_v0 = vld [vmem:[#allocation10 + $0x18] sm:$0xff]  ;;  %v134_v1 = vld [vmem:[#allocation10 + $0x10] sm:$0xff]  ;;  %vm136_vm0 = vcmask 261120   ;;  %vm277_vm1 = vcmask 130048  }
  0x1e   :  { %161 = vmatpush.msra.mxu0 %v135_v0  ;;  %v133_v2 = vld [vmem:[#allocation10 + $0x8] sm:$0xff]  ;;  %v917_v3 = vld [vmem:[#allocation8 + $0x18] sm:$0xff]  ;;  %v919_v4 = vld [vmem:[#allocation8 + $0x10] sm:$0xff]  ;;  %s847_s4 = smov 96   ;;  %s848_s5 = smov [#allocation13]  }
  0x1f   :  { %198 = vmatpush.msra.mxu1 %v917_v3  ;;  %v132_v5 = vld [vmem:[#allocation10] sm:$0xff]  ;;  %v922_v6 = vld [vmem:[#allocation8 + $0x8] sm:$0xff]  ;;  %v119_v10 = vld [vmem:[#allocation2 + $0x8] sm:$0xff]  ;;  %s573_s27 = sshll.u32 %s848_s5, 4  ;;  %s575_s8 = sshll.u32 %s1019_s6, 4  ;;  %s574_s27 = int_to_ptr.vmem [resolvable:$true] %s573_s27  ;;  %s576_s8 = int_to_ptr.hbm [resolvable:$true] %s575_s8 }
  0x20   :  { %162 = vmatpush.msra.mxu0 %v134_v1  ;;  %v118_v7 = vld [vmem:[#allocation2] sm:$0xff]  ;;  %v925_v8 = vld [vmem:[#allocation8] sm:$0xff]  ;;  %v934_v11 = vld [vmem:[#allocation5 + $0x8] sm:$0xff] }
  0x21   :  { %199 = vmatpush.msra.mxu1 %v919_v4  ;;  %v928_v9 = vld [vmem:[#allocation5] sm:$0xff]  ;;  %v120_v12 = vld [vmem:[#allocation2 + $0x10] sm:$0xff]  ;;  %v121_v13 = vld [vmem:[#allocation2 + $0x18] sm:$0xff] }
  0x22   :  { %163 = vmatpush.msra.mxu0 %v133_v2  ;;  %v959_v20 = vld [vmem:[#allocation7] ss:$0 sm:$0xff]  ;;  %v963_v25 = vld [vmem:[#allocation7 + $0x1] ss:$0 sm:$0xff]  ;;  %v130_v43 = vld [vmem:[#allocation11 + $0x10] sm:$0xff] }
  0x23   :  { %200 = vmatpush.msra.mxu1 %v922_v6  ;;  %v131_v42 = vld [vmem:[#allocation11 + $0x18] sm:$0xff]  ;;  %v129_v44 = vld [vmem:[#allocation11 + $0x8] sm:$0xff]  ;;  %v128_v45 = vld [vmem:[#allocation11] sm:$0xff] }
  0x24   :  { %164 = vmatpush.msra.mxu0 %v132_v5 }
  0x25   :  { %591 = vmatmul.msk.f32.vlgmr.msra.gmra.mxu0 %vm136_vm0, %v118_v7  ;;  %201 = vmatpush.msra.mxu1 %v925_v8 }
  0x26   :  { %595 = vmatmul.msk.f32.vlgmr.msra.gmra.mxu1 %vm136_vm0, %v928_v9 }
  0x27   :  { %376 = vmatpush.msrb.mxu1 %v131_v42 }
  0x29   :  { %377 = vmatpush.msrb.mxu1 %v130_v43 }
  0x2b   :  { %378 = vmatpush.msrb.mxu1 %v129_v44 }
  0x2d   :  { %592 = vmatmul.msk.f32.gmra.mxu0 %vm136_vm0, %v119_v10  ;;  %379 = vmatpush.msrb.mxu1 %v128_v45 }
  0x2e   :  { %596 = vmatmul.msk.f32.gmra.mxu1 %vm136_vm0, %v934_v11 }
  0x35   :  { %593 = vmatmul.msk.f32.gmra.mxu0 %vm136_vm0, %v120_v12 }
  0x3d   :  { %594 = vmatmul.msk.f32.gmra.mxu0 %vm136_vm0, %v121_v13 }
  0xa2   :  { %v941_v14 = vpop.f32.mrf.mxu0 }
  0xa3   :  { %v203_v16 = vpop.f32.mrf.mxu1 }
  0xaa   :  { %v943_v15 = vpop.f32.mrf.mxu0 }
  0xab   :  { %597 = vmatpush.xpose.msk.msra.mxu3 %vm136_vm0, %v943_v15  ;;  %v206_v19 = vpop.f32.mrf.mxu1  ;;  %v631_v40 = vpack.i.bf16 %v941_v14, %v943_v15 }
  0xaf   :  { %598 = vmatpush.xpose.msk.msra.mxu3 %vm136_vm0, %v941_v14 }
  0xb2   :  { %v949_v17 = vpop.f32.mrf.mxu0  ;;  %599 = vmatmul.msk.f32.vlgmr.msra.gmra.mxu3 %vm136_vm0, %v203_v16 }
  0xba   :  { %v952_v18 = vpop.f32.mrf.mxu0 }
  0xbb   :  { %600 = vmatpush.xpose.msk.msrb.mxu3 %vm136_vm0, %v952_v18  ;;  %v636_v41 = vpack.i.bf16 %v949_v17, %v952_v18 }
  0xbf   :  { %601 = vmatpush.xpose.msk.msrb.mxu3 %vm136_vm0, %v949_v17 }
  0xc2   :  { %602 = vmatmul.msk.f32.vlgmr.msrb.gmra.mxu3 %vm136_vm0, %v206_v19 }
 0x135   :  { %v235_v21 = vpop.f32.mrf.mxu3 }
 0x136   :  { %v267_v22 = vmul.f32 0.17677669, %v235_v21 }
 0x138   :  { %v275_v23 = vadd.f32 %v959_v20, %v267_v22 }
 0x13a   :  { %v278_v24 = vsel %vm277_vm1, %v275_v23, -inf }
 0x13b   :  { %279 = vmax.xlane.f32.xlu0 %v278_v24 }
 0x145   :  { %v264_v26 = vpop.f32.mrf.mxu3 }
 0x146   :  { %v268_v27 = vmul.f32 0.17677669, %v264_v26 }
 0x148   :  { %v276_v28 = vadd.f32 %v963_v25, %v268_v27 }
 0x14a   :  { %v281_v29 = vsel %vm277_vm1, %v276_v28, -inf }
 0x14b   :  { %282 = vmax.xlane.f32.xlu0 %v281_v29 }
 0x1ae   :  { %v280_v30 = vpop.xlane.xlu0 %279 }
 0x1af   :  { %v284_v31 = vsub.f32 %v275_v23, %v280_v30 }
 0x1b1   :  { %v286_v32 = vmul.f32 1.442695, %v284_v31 }
 0x1b3   :  { %643 = vpow2.f32 %v286_v32 }
 0x1b9   :  { %v644_v33 = vpop.eup %643 }
 0x1ba   :  { %v290_v34 = vsel %vm277_vm1, %v644_v33, 0.0 }
 0x1bb   :  { %291 = vadd.xlane.f32.xlu1 %v290_v34 }
 0x1be   :  { %v283_v35 = vpop.xlane.xlu0 %282 }
 0x1bf   :  { %v285_v36 = vsub.f32 %v276_v28, %v283_v35 }
 0x1c1   :  { %v288_v37 = vmul.f32 1.442695, %v285_v36 }
 0x1c3   :  { %645 = vpow2.f32 %v288_v37 }
 0x1c9   :  { %v646_v38 = vpop.eup %645 }
 0x1ca   :  { %v293_v39 = vsel %vm277_vm1, %v646_v38, 0.0 }
 0x1cb   :  { %294 = vadd.xlane.f32.xlu2 %v293_v39 }
 0x1d4   :  { %632 = vrot.lane.b32.xlu1 %v631_v40, %s847_s4 }
 0x1e3   :  { %637 = vrot.lane.b32.xlu2 %v636_v41, %s847_s4 }
 0x22e   :  { %v292_v46 = vpop.xlane.xlu1 %291 }
 0x22f   :  { %647 = vrcp.f32 %v292_v46 }
 0x235   :  { %v648_v50 = vpop.eup %647 }
 0x236   :  { %v298_v57 = vmul.f32 %v648_v50, %v644_v33 }
 0x23e   :  { %v295_v47 = vpop.xlane.xlu2 %294 }
 0x23f   :  { %649 = vrcp.f32 %v295_v47 }
 0x245   :  { %v650_v53 = vpop.eup %649 }
 0x246   :  { %v633_v48 = vpop.permute.xlu1 %632  ;;  %v638_v49 = vpop.permute.xlu2 %637  ;;  %v299_v56 = vmul.f32 %v650_v53, %v646_v38 }
 0x247   :  { %v634_v51 = vunpack.i.l.bf16 %v633_v48  ;;  %v639_v52 = vunpack.i.l.bf16 %v638_v49  ;;  %v635_v54 = vunpack.i.h.bf16 %v633_v48  ;;  %v640_v55 = vunpack.i.h.bf16 %v638_v49 }
 0x249   :  { %323 = vmatpush.msra.mxu2 %v634_v51  ;;  %352 = vmatpush.msra.mxu3 %v639_v52 }
 0x24a   :  { %507 = vmatpush.msrb.mxu0 %v634_v51  ;;  %530 = vmatpush.msra.mxu1 %v639_v52 }
 0x24b   :  { %324 = vmatpush.msra.mxu2 %v635_v54  ;;  %353 = vmatpush.msra.mxu3 %v640_v55 }
 0x24c   :  { %508 = vmatpush.msrb.mxu0 %v635_v54  ;;  %531 = vmatpush.msra.mxu1 %v640_v55 }
 0x24d   :  { %603 = vmatmul.msk.f32.vlgmr.msra.gmra.mxu2 %vm277_vm1, %v298_v57  ;;  %604 = vmatmul.msk.f32.vlgmr.msra.gmra.mxu3 %vm277_vm1, %v299_v56 }
 0x24e   :  { %609 = vmatpush.xpose.msk.msrb.mxu3 %vm136_vm0, %v943_v15  ;;  %407 = vmatpush.msrb.mxu2 %v917_v3 }
 0x250   :  { %408 = vmatpush.msrb.mxu2 %v919_v4 }
 0x252   :  { %610 = vmatpush.xpose.msk.msrb.mxu3 %vm136_vm0, %v941_v14  ;;  %409 = vmatpush.msrb.mxu2 %v922_v6 }
 0x254   :  { %410 = vmatpush.msrb.mxu2 %v925_v8 }
 0x256   :  { %612 = vmatpush.xpose.msk.msra.mxu3 %vm136_vm0, %v952_v18  ;;  %554 = vmatpush.msra.mxu2 %v131_v42 }
 0x258   :  { %555 = vmatpush.msra.mxu2 %v130_v43 }
 0x25a   :  { %613 = vmatpush.xpose.msk.msra.mxu3 %vm136_vm0, %v949_v17  ;;  %556 = vmatpush.msra.mxu2 %v129_v44 }
 0x25c   :  { %557 = vmatpush.msra.mxu2 %v128_v45 }
 0x2d0   :  { %v326_v58 = vpop.f32.mrf.mxu2  ;;  %v355_v59 = vpop.f32.mrf.mxu3 }
 0x2d1   :  { %605 = vmatmul.msk.f32.vlgmr.msrb.gmra.mxu1 %vm136_vm0, %v326_v58 }
 0x2d9   :  { %606 = vmatmul.msk.f32.gmra.mxu1 %vm136_vm0, %v355_v59 }
 0x34e   :  { %v381_v60 = vpop.f32.mrf.mxu1 }
 0x34f   :  { %v387_v61 = vadd.f32 %v381_v60, %v928_v9 }
 0x351   :  { %607 = vmatmul.msk.f32.vlgmr.msrb.gmra.mxu2 %vm136_vm0, %v387_v61 }
 0x356   :  { %v384_v62 = vpop.f32.mrf.mxu1 }
 0x357   :  { %v388_v63 = vadd.f32 %v384_v62, %v934_v11 }
 0x359   :  { %608 = vmatmul.msk.f32.gmra.mxu2 %vm136_vm0, %v388_v63 }
 0x3d4   :  { %v412_v0 = vpop.f32.mrf.mxu2 }
 0x3d5   :  { %611 = vmatmul.msk.f32.vlgmr.msrb.gmra.mxu3 %vm136_vm0, %v412_v0 }
 0x3dc   :  { %v415_v1 = vpop.f32.mrf.mxu2 }
 0x3dd   :  { %614 = vmatmul.msk.f32.vlgmr.msra.gmra.mxu3 %vm136_vm0, %v415_v1 }
 0x458   :  { %v438_v2 = vpop.f32.mrf.mxu3 }
 0x459   :  { %v464_v3 = vmul.f32 0.17677669, %v438_v2 }
 0x45b   :  { %v466_v4 = vadd.f32 %v959_v20, %v464_v3 }
 0x45d   :  { %v468_v5 = vsel %vm277_vm1, %v466_v4, -inf }
 0x45e   :  { %469 = vmax.xlane.f32.xlu0 %v468_v5 }
 0x460   :  { %v461_v6 = vpop.f32.mrf.mxu3 }
 0x461   :  { %v465_v7 = vmul.f32 0.17677669, %v461_v6 }
 0x463   :  { %v467_v8 = vadd.f32 %v963_v25, %v465_v7 }
 0x465   :  { %v471_v9 = vsel %vm277_vm1, %v467_v8, -inf }
 0x466   :  { %472 = vmax.xlane.f32.xlu0 %v471_v9 }
 0x4d1   :  { %v470_v10 = vpop.xlane.xlu0 %469 }
 0x4d2   :  { %v474_v11 = vsub.f32 %v466_v4, %v470_v10 }
 0x4d4   :  { %v476_v12 = vmul.f32 1.442695, %v474_v11 }
 0x4d6   :  { %651 = vpow2.f32 %v476_v12 }
 0x4d9   :  { %v473_v13 = vpop.xlane.xlu0 %472 }
 0x4da   :  { %v475_v14 = vsub.f32 %v467_v8, %v473_v13 }
 0x4dc   :  { %v652_v15 = vpop.eup %651  ;;  %v478_v16 = vmul.f32 1.442695, %v475_v14 }
 0x4dd   :  { %v480_v17 = vsel %vm277_vm1, %v652_v15, 0.0 }
 0x4de   :  { %653 = vpow2.f32 %v478_v16  ;;  %481 = vadd.xlane.f32.xlu0 %v480_v17 }
 0x4e4   :  { %v654_v18 = vpop.eup %653 }
 0x4e5   :  { %v483_v19 = vsel %vm277_vm1, %v654_v18, 0.0 }
 0x4e6   :  { %484 = vadd.xlane.f32.xlu2 %v483_v19 }
 0x551   :  { %v482_v20 = vpop.xlane.xlu0 %481 }
 0x552   :  { %655 = vrcp.f32 %v482_v20 }
 0x558   :  { %v656_v21 = vpop.eup %655 }
 0x559   :  { %v488_v22 = vmul.f32 %v656_v21, %v652_v15  ;;  %v485_v23 = vpop.xlane.xlu2 %484 }
 0x55a   :  { %657 = vrcp.f32 %v485_v23 }
 0x55b   :  { %615 = vmatmul.msk.f32.vlgmr.msrb.gmra.mxu0 %vm277_vm1, %v488_v22 }
 0x560   :  { %v658_v24 = vpop.eup %657 }
 0x561   :  { %v489_v25 = vmul.f32 %v658_v24, %v654_v18 }
 0x563   :  { %616 = vmatmul.msk.f32.vlgmr.msra.gmra.mxu1 %vm277_vm1, %v489_v25 }
 0x5d8   :  { %v510_v26 = vpop.f32.mrf.mxu0 }
 0x5d9   :  { %617 = vmatmul.msk.f32.vlgmr.msra.gmra.mxu2 %vm136_vm0, %v510_v26 }
 0x5e0   :  { %v533_v27 = vpop.f32.mrf.mxu1 }
 0x5e1   :  { %618 = vmatmul.msk.f32.gmra.mxu2 %vm136_vm0, %v533_v27 }
 0x65c   :  { %v559_v28 = vpop.f32.mrf.mxu2 }
 0x65d   :  { %v565_v29 = vadd.f32 %v559_v28, %v387_v61 }
 0x65f   :  { %567 = vst.msk [vmem:[#allocation13] sm:$0xff] %vm136_vm0, %v565_v29 }
 0x664   :  { %v562_v30 = vpop.f32.mrf.mxu2 }
 0x665   :  { %v566_v31 = vadd.f32 %v562_v30, %v388_v63 }
 0x667   :  { %568 = vst.msk [vmem:[#allocation13 + $0x8] sm:$0xff] %vm136_vm0, %v566_v31 }
 0x668   :  { %581 = dma.vmem_to_hbm [thread:$0]  %s574_s27, 256, %s576_s8, [#allocation4], %s838_s29, %s838_s29, %s839_s30  }
 0x669   :  { %835 = dma.done.wait [#allocation4], 256  }
 0x66a   :  { %836 = vsyncadd [#allocation4], 4294967040 }
 0x66b   :  { %586 = vsyncpa [#allocation3], 1 }
 0x66c   :  { %587 = vsyncpa [#allocation6], 1 }
 0x66d   :  { %588 = vsyncpa [#allocation9], 1 }
 0x66e   :  { %589 = vsyncpa [#allocation12], 1 }
 0x66f   :  { %590 = vsyncpa [#allocation4], 1 }

</bundles_post_ra>
